<compile_context>
chip_gen: v5e
topology: v5e:2x2
jax: 0.10.0
libtpu: 0.0.40
codegen_flags: <defaults>
</compile_context>

<pallas_src>
import functools

import jax
import jax.numpy as jnp
from jax.experimental import pallas as pl
from jax.experimental.pallas import tpu as pltpu


# ----------------------------------------------------------------------------
# Fused forward kernel
# ----------------------------------------------------------------------------

def _full_spec(shape):
    # Full-array block (no grid): everything lives in VMEM for the whole kernel.
    return pl.BlockSpec(shape, lambda: tuple(0 for _ in shape))


def _fused_forward_kernel(
    a_ref, x_ref,
    w1_ref, w2_ref, w3_ref, wenc_ref, wdec_ref, w4_ref, w5_ref, w6_ref,
    bias_ref,
    o_ref,
    d_s, h4_s,
    *, batch, nodes, e2, e3, bias_lens,
):
    f32 = jnp.float32
    a = a_ref[...]                      # A_norm: loaded once, reused by all 6 GCN layers

    def bias_row(i):
        return bias_ref[i:i + 1, 0:bias_lens[i]]            # (1, f_out)

    def gcn(h, w_ref_, bias_idx, relu, xw_first):
        w = w_ref_[...]
        if xw_first:   # f_out <= f_in: keep the intermediate at [N, f_out]
            y = jnp.dot(a, jnp.dot(h, w, preferred_element_type=f32),
                        preferred_element_type=f32)
        else:          # f_in < f_out: keep the intermediate at [N, f_in]
            y = jnp.dot(jnp.dot(a, h, preferred_element_type=f32), w,
                        preferred_element_type=f32)
        y = y + bias_row(bias_idx)
        return jnp.maximum(y, 0.0) if relu else y

    # --- GCN encoder stack: conv1, conv2 (+ReLU), conv3 (no ReLU before view) ---
    h = x_ref[...]
    h = gcn(h, w1_ref, 0, relu=True, xw_first=False)
    h = gcn(h, w2_ref, 1, relu=True, xw_first=False)
    h3 = gcn(h, w3_ref, 2, relu=False, xw_first=True)        # (batch*nodes, e2)

    # --- x.view(-1, nodes*e2) fused with the encoder Linear (no in-kernel
    #     reshape):  z[b] = b_enc + sum_n h3[b*nodes+n] @ W_enc[n*e2:(n+1)*e2] ---
    # TODO(synk): Encoder/Decoder internals are not given in the source; each is
    # modeled as a single Linear layer (no hidden layers / extra activations).
    z_rows = []
    for b in range(batch):
        acc = bias_row(3)
        for n in range(nodes):
            r = b * nodes + n
            acc = acc + jnp.dot(h3[r:r + 1, :],
                                wenc_ref[n * e2:(n + 1) * e2, :],
                                preferred_element_type=f32)
        z_rows.append(acc)
    z = jnp.concatenate(z_rows, axis=0)                       # (batch, latent)

    # --- decoder Linear, then x.view(-1, e3) back to node layout via static
    #     row copies through VMEM scratch (no in-kernel reshape) ---
    d_s[...] = jnp.dot(z, wdec_ref[...], preferred_element_type=f32) + bias_row(4)
    for b in range(batch):
        for n in range(nodes):
            h4_s[b * nodes + n: b * nodes + n + 1, :] = \
                d_s[b:b + 1, n * e3:(n + 1) * e3]

    # --- GCN decoder stack: conv4, conv5 (+ReLU), conv6 (NO ReLU, per reference) ---
    h = gcn(h4_s[...], w4_ref, 5, relu=True, xw_first=False)
    h = gcn(h, w5_ref, 6, relu=True, xw_first=False)
    h = gcn(h, w6_ref, 7, relu=False, xw_first=True)          # (batch*nodes, 1)

    # Single masked store at the very end; final view(-1, nodes) is a free
    # reshape outside the kernel.
    o_ref[...] = h.astype(o_ref.dtype)


def model3_forward(params, x, a_norm, *, batch_size, num_nodes, embedding_sequence):
    n_total = batch_size * num_nodes
    e2 = embedding_sequence[2]
    e3 = embedding_sequence[3]

    layer_order = ["conv1", "conv2", "conv3", "encoder", "decoder",
                   "conv4", "conv5", "conv6"]
    bias_lens = tuple(int(params[name]["b"].shape[0]) for name in layer_order)
    bias_width = max(bias_lens)
    bias_packed = jnp.zeros((len(layer_order), bias_width), jnp.float32)
    for i, name in enumerate(layer_order):
        bias_packed = bias_packed.at[i, :bias_lens[i]].set(params[name]["b"])

    weights = [params[name]["w"] for name in layer_order]

    kernel = functools.partial(
        _fused_forward_kernel,
        batch=batch_size, nodes=num_nodes, e2=e2, e3=e3, bias_lens=bias_lens,
    )

    # TODO(synk): at realistic graph sizes, tile A_norm with a (128,128) grid
    # (reduction axis last, dimension_semantics=("parallel","parallel","arbitrary"))
    # and feed the MXU bf16 inputs; at this toy size everything fits in one tile.
    out_flat = pl.pallas_call(
        kernel,
        out_shape=jax.ShapeDtypeStruct((n_total, 1), jnp.float32),
        in_specs=[_full_spec(a_norm.shape), _full_spec(x.shape)]
                 + [_full_spec(w.shape) for w in weights]
                 + [_full_spec(bias_packed.shape)],
        out_specs=_full_spec((n_total, 1)),
        scratch_shapes=[
            pltpu.VMEM((batch_size, num_nodes * e3), jnp.float32),  # decoder output
            pltpu.VMEM((n_total, e3), jnp.float32),                 # node-layout conv4 input
        ],
    )(a_norm, x, *weights, bias_packed)

    return out_flat.reshape(batch_size, num_nodes)


# ----------------------------------------------------------------------------
# Graph preprocessing (plain JAX, done once for a static graph):
#   M[dst,src]=1 for every edge, diagonal set to 1 (dedup self-loops),
#   A_norm = D^{-1/2} M D^{-1/2}   (PyG gcn_norm for undirected graphs)
# ----------------------------------------------------------------------------

def build_normalized_adjacency(edge_index, num_nodes_total):
    src, dst = edge_index[0], edge_index[1]
    adj = jnp.zeros((num_nodes_total, num_nodes_total), jnp.float32)
    adj = adj.at[dst, src].set(1.0)                 # message src -> dst
    diag = jnp.arange(num_nodes_total)
    adj = adj.at[diag, diag].set(1.0)               # self loops (deduplicated)
    deg = jnp.sum(adj, axis=1)
    d_inv_sqrt = jnp.where(deg > 0, 1.0 / jnp.sqrt(deg), 0.0)
    return adj * d_inv_sqrt[:, None] * d_inv_sqrt[None, :]


# ----------------------------------------------------------------------------
# Parameter init
# ----------------------------------------------------------------------------

def init_params(key, num_nodes, num_features, embedding_sequence, latent_space_dim):
    dims = [
        ("conv1", num_features, embedding_sequence[0]),
        ("conv2", embedding_sequence[0], embedding_sequence[1]),
        ("conv3", embedding_sequence[1], embedding_sequence[2]),
        ("encoder", num_nodes * embedding_sequence[2], latent_space_dim),
        ("decoder", latent_space_dim, num_nodes * embedding_sequence[3]),
        ("conv4", embedding_sequence[3], embedding_sequence[4]),
        ("conv5", embedding_sequence[4], embedding_sequence[5]),
        ("conv6", embedding_sequence[5], 1),
    ]
    params = {}
    keys = jax.random.split(key, len(dims))
    for k, (name, fi, fo) in zip(keys, dims):
        scale = jnp.sqrt(2.0 / (fi + fo))
        params[name] = {
            "w": jax.random.normal(k, (fi, fo), jnp.float32) * scale,
            "b": jnp.zeros((fo,), jnp.float32),
        }
    return params


# ----------------------------------------------------------------------------
# Main
# ----------------------------------------------------------------------------

if __name__ == "__main__":
    num_nodes = 8
    num_features = 4
    embedding_sequence = [16, 16, 8, 8, 16, 16]
    latent_space_dim = 16
    batch_size = 2
    n_total = batch_size * num_nodes

    key = jax.random.PRNGKey(0)
    k_x, k_p = jax.random.split(key)

    # Node features for all graphs in the batch.
    x = jax.random.normal(k_x, (n_total, num_features), jnp.float32)

    # Deterministic edge_index: bidirectional ring within each graph of the batch.
    srcs, dsts = [], []
    for g in range(batch_size):
        off = g * num_nodes
        for i in range(num_nodes):
            j = (i + 1) % num_nodes
            srcs += [off + i, off + j]
            dsts += [off + j, off + i]
    edge_index = jnp.array([srcs, dsts], dtype=jnp.int32)

    params = init_params(k_p, num_nodes, num_features, embedding_sequence,
                         latent_space_dim)

    # Graph is static: build the normalized adjacency once, outside the hot path.
    a_norm = build_normalized_adjacency(edge_index, n_total)

    fwd = jax.jit(functools.partial(
        model3_forward,
        batch_size=batch_size,
        num_nodes=num_nodes,
        embedding_sequence=tuple(embedding_sequence)))

    out = jax.block_until_ready(fwd(params, x, a_norm))

    assert out.shape == (batch_size, num_nodes), out.shape
    assert jnp.all(jnp.isfinite(out))
    print("KERNEL_OK")
</pallas_src>

<mosaic_0001>
module attributes {stable_mosaic.version = 11 : i64} {
  func.func @_fused_forward_kernel(%arg0: memref<16x16xf32, #tpu.memory_space<vmem>>, %arg1: memref<16x4xf32, #tpu.memory_space<vmem>>, %arg2: memref<4x16xf32, #tpu.memory_space<vmem>>, %arg3: memref<16x16xf32, #tpu.memory_space<vmem>>, %arg4: memref<16x8xf32, #tpu.memory_space<vmem>>, %arg5: memref<64x16xf32, #tpu.memory_space<vmem>>, %arg6: memref<16x64xf32, #tpu.memory_space<vmem>>, %arg7: memref<8x16xf32, #tpu.memory_space<vmem>>, %arg8: memref<16x16xf32, #tpu.memory_space<vmem>>, %arg9: memref<16x1xf32, #tpu.memory_space<vmem>>, %arg10: memref<8x64xf32, #tpu.memory_space<vmem>>, %arg11: memref<16x1xf32, #tpu.memory_space<vmem>>, %arg12: memref<2x64xf32, #tpu.memory_space<vmem>>, %arg13: memref<16x8xf32, #tpu.memory_space<vmem>>) attributes {dimension_semantics = [], scalar_prefetch = 0 : i64, scratch_operands = 2 : i64, tpu.core_type = #tpu.core_type<tc>} {
    %c0 = arith.constant 0 : index
    %c0_0 = arith.constant 0 : index
    %0 = vector.load %arg0[%c0, %c0_0] : memref<16x16xf32, #tpu.memory_space<vmem>>, vector<16x16xf32>
    %c0_1 = arith.constant 0 : index
    %c0_2 = arith.constant 0 : index
    %1 = vector.load %arg1[%c0_1, %c0_2] : memref<16x4xf32, #tpu.memory_space<vmem>>, vector<16x4xf32>
    %c0_3 = arith.constant 0 : index
    %c0_4 = arith.constant 0 : index
    %2 = vector.load %arg2[%c0_3, %c0_4] : memref<4x16xf32, #tpu.memory_space<vmem>>, vector<4x16xf32>
    %cst = arith.constant dense<0.000000e+00> : vector<16x4xf32>
    %3 = tpu.matmul %0, %1, %cst {dimension_numbers = #tpu.dot_dimension_numbers<[1], [0], [0], [1], [0, 0, 1, 1], [], []>} : vector<16x16xf32>, vector<16x4xf32>, vector<16x4xf32> -> vector<16x4xf32>
    %cst_5 = arith.constant dense<0.000000e+00> : vector<16x16xf32>
    %4 = tpu.matmul %3, %2, %cst_5 {dimension_numbers = #tpu.dot_dimension_numbers<[1], [0], [0], [1], [0, 0, 1, 1], [], []>} : vector<16x4xf32>, vector<4x16xf32>, vector<16x16xf32> -> vector<16x16xf32>
    %c0_6 = arith.constant 0 : index
    %c0_7 = arith.constant 0 : index
    %5 = vector.load %arg10[%c0_6, %c0_7] : memref<8x64xf32, #tpu.memory_space<vmem>>, vector<1x16xf32>
    %6 = vector.broadcast %5 : vector<1x16xf32> to vector<16x16xf32>
    %7 = arith.addf %4, %6 : vector<16x16xf32>
    %cst_8 = arith.constant 0.000000e+00 : f32
    %8 = vector.broadcast %cst_8 : f32 to vector<16x16xf32>
    %9 = arith.maximumf %7, %8 : vector<16x16xf32>
    %c0_9 = arith.constant 0 : index
    %c0_10 = arith.constant 0 : index
    %10 = vector.load %arg3[%c0_9, %c0_10] : memref<16x16xf32, #tpu.memory_space<vmem>>, vector<16x16xf32>
    %cst_11 = arith.constant dense<0.000000e+00> : vector<16x16xf32>
    %11 = tpu.matmul %0, %9, %cst_11 {dimension_numbers = #tpu.dot_dimension_numbers<[1], [0], [0], [1], [0, 0, 1, 1], [], []>} : vector<16x16xf32>, vector<16x16xf32>, vector<16x16xf32> -> vector<16x16xf32>
    %cst_12 = arith.constant dense<0.000000e+00> : vector<16x16xf32>
    %12 = tpu.matmul %11, %10, %cst_12 {dimension_numbers = #tpu.dot_dimension_numbers<[1], [0], [0], [1], [0, 0, 1, 1], [], []>} : vector<16x16xf32>, vector<16x16xf32>, vector<16x16xf32> -> vector<16x16xf32>
    %c1 = arith.constant 1 : index
    %c0_13 = arith.constant 0 : index
    %13 = vector.load %arg10[%c1, %c0_13] : memref<8x64xf32, #tpu.memory_space<vmem>>, vector<1x16xf32>
    %14 = vector.broadcast %13 : vector<1x16xf32> to vector<16x16xf32>
    %15 = arith.addf %12, %14 : vector<16x16xf32>
    %cst_14 = arith.constant 0.000000e+00 : f32
    %16 = vector.broadcast %cst_14 : f32 to vector<16x16xf32>
    %17 = arith.maximumf %15, %16 : vector<16x16xf32>
    %c0_15 = arith.constant 0 : index
    %c0_16 = arith.constant 0 : index
    %18 = vector.load %arg4[%c0_15, %c0_16] : memref<16x8xf32, #tpu.memory_space<vmem>>, vector<16x8xf32>
    %cst_17 = arith.constant dense<0.000000e+00> : vector<16x8xf32>
    %19 = tpu.matmul %17, %18, %cst_17 {dimension_numbers = #tpu.dot_dimension_numbers<[1], [0], [0], [1], [0, 0, 1, 1], [], []>} : vector<16x16xf32>, vector<16x8xf32>, vector<16x8xf32> -> vector<16x8xf32>
    %cst_18 = arith.constant dense<0.000000e+00> : vector<16x8xf32>
    %20 = tpu.matmul %0, %19, %cst_18 {dimension_numbers = #tpu.dot_dimension_numbers<[1], [0], [0], [1], [0, 0, 1, 1], [], []>} : vector<16x16xf32>, vector<16x8xf32>, vector<16x8xf32> -> vector<16x8xf32>
    %c2 = arith.constant 2 : index
    %c0_19 = arith.constant 0 : index
    %21 = vector.load %arg10[%c2, %c0_19] : memref<8x64xf32, #tpu.memory_space<vmem>>, vector<1x8xf32>
    %22 = vector.broadcast %21 : vector<1x8xf32> to vector<16x8xf32>
    %23 = arith.addf %20, %22 : vector<16x8xf32>
    %c3 = arith.constant 3 : index
    %c0_20 = arith.constant 0 : index
    %24 = vector.load %arg10[%c3, %c0_20] : memref<8x64xf32, #tpu.memory_space<vmem>>, vector<1x16xf32>
    %25 = vector.extract_strided_slice %23 {offsets = [0, 0], sizes = [1, 8], strides = [1, 1]} : vector<16x8xf32> to vector<1x8xf32>
    %c0_21 = arith.constant 0 : index
    %c0_22 = arith.constant 0 : index
    %26 = vector.load %arg5[%c0_21, %c0_22] : memref<64x16xf32, #tpu.memory_space<vmem>>, vector<8x16xf32>
    %cst_23 = arith.constant dense<0.000000e+00> : vector<1x16xf32>
    %27 = tpu.matmul %25, %26, %cst_23 {dimension_numbers = #tpu.dot_dimension_numbers<[1], [0], [0], [1], [0, 0, 1, 1], [], []>} : vector<1x8xf32>, vector<8x16xf32>, vector<1x16xf32> -> vector<1x16xf32>
    %28 = arith.addf %24, %27 : vector<1x16xf32>
    %29 = vector.extract_strided_slice %23 {offsets = [1, 0], sizes = [1, 8], strides = [1, 1]} : vector<16x8xf32> to vector<1x8xf32>
    %c8 = arith.constant 8 : index
    %c0_24 = arith.constant 0 : index
    %30 = vector.load %arg5[%c8, %c0_24] : memref<64x16xf32, #tpu.memory_space<vmem>>, vector<8x16xf32>
    %cst_25 = arith.constant dense<0.000000e+00> : vector<1x16xf32>
    %31 = tpu.matmul %29, %30, %cst_25 {dimension_numbers = #tpu.dot_dimension_numbers<[1], [0], [0], [1], [0, 0, 1, 1], [], []>} : vector<1x8xf32>, vector<8x16xf32>, vector<1x16xf32> -> vector<1x16xf32>
    %32 = arith.addf %28, %31 : vector<1x16xf32>
    %33 = vector.extract_strided_slice %23 {offsets = [2, 0], sizes = [1, 8], strides = [1, 1]} : vector<16x8xf32> to vector<1x8xf32>
    %c16 = arith.constant 16 : index
    %c0_26 = arith.constant 0 : index
    %34 = vector.load %arg5[%c16, %c0_26] : memref<64x16xf32, #tpu.memory_space<vmem>>, vector<8x16xf32>
    %cst_27 = arith.constant dense<0.000000e+00> : vector<1x16xf32>
    %35 = tpu.matmul %33, %34, %cst_27 {dimension_numbers = #tpu.dot_dimension_numbers<[1], [0], [0], [1], [0, 0, 1, 1], [], []>} : vector<1x8xf32>, vector<8x16xf32>, vector<1x16xf32> -> vector<1x16xf32>
    %36 = arith.addf %32, %35 : vector<1x16xf32>
    %37 = vector.extract_strided_slice %23 {offsets = [3, 0], sizes = [1, 8], strides = [1, 1]} : vector<16x8xf32> to vector<1x8xf32>
    %c24 = arith.constant 24 : index
    %c0_28 = arith.constant 0 : index
    %38 = vector.load %arg5[%c24, %c0_28] : memref<64x16xf32, #tpu.memory_space<vmem>>, vector<8x16xf32>
    %cst_29 = arith.constant dense<0.000000e+00> : vector<1x16xf32>
    %39 = tpu.matmul %37, %38, %cst_29 {dimension_numbers = #tpu.dot_dimension_numbers<[1], [0], [0], [1], [0, 0, 1, 1], [], []>} : vector<1x8xf32>, vector<8x16xf32>, vector<1x16xf32> -> vector<1x16xf32>
    %40 = arith.addf %36, %39 : vector<1x16xf32>
    %41 = vector.extract_strided_slice %23 {offsets = [4, 0], sizes = [1, 8], strides = [1, 1]} : vector<16x8xf32> to vector<1x8xf32>
    %c32 = arith.constant 32 : index
    %c0_30 = arith.constant 0 : index
    %42 = vector.load %arg5[%c32, %c0_30] : memref<64x16xf32, #tpu.memory_space<vmem>>, vector<8x16xf32>
    %cst_31 = arith.constant dense<0.000000e+00> : vector<1x16xf32>
    %43 = tpu.matmul %41, %42, %cst_31 {dimension_numbers = #tpu.dot_dimension_numbers<[1], [0], [0], [1], [0, 0, 1, 1], [], []>} : vector<1x8xf32>, vector<8x16xf32>, vector<1x16xf32> -> vector<1x16xf32>
    %44 = arith.addf %40, %43 : vector<1x16xf32>
    %45 = vector.extract_strided_slice %23 {offsets = [5, 0], sizes = [1, 8], strides = [1, 1]} : vector<16x8xf32> to vector<1x8xf32>
    %c40 = arith.constant 40 : index
    %c0_32 = arith.constant 0 : index
    %46 = vector.load %arg5[%c40, %c0_32] : memref<64x16xf32, #tpu.memory_space<vmem>>, vector<8x16xf32>
    %cst_33 = arith.constant dense<0.000000e+00> : vector<1x16xf32>
    %47 = tpu.matmul %45, %46, %cst_33 {dimension_numbers = #tpu.dot_dimension_numbers<[1], [0], [0], [1], [0, 0, 1, 1], [], []>} : vector<1x8xf32>, vector<8x16xf32>, vector<1x16xf32> -> vector<1x16xf32>
    %48 = arith.addf %44, %47 : vector<1x16xf32>
    %49 = vector.extract_strided_slice %23 {offsets = [6, 0], sizes = [1, 8], strides = [1, 1]} : vector<16x8xf32> to vector<1x8xf32>
    %c48 = arith.constant 48 : index
    %c0_34 = arith.constant 0 : index
    %50 = vector.load %arg5[%c48, %c0_34] : memref<64x16xf32, #tpu.memory_space<vmem>>, vector<8x16xf32>
    %cst_35 = arith.constant dense<0.000000e+00> : vector<1x16xf32>
    %51 = tpu.matmul %49, %50, %cst_35 {dimension_numbers = #tpu.dot_dimension_numbers<[1], [0], [0], [1], [0, 0, 1, 1], [], []>} : vector<1x8xf32>, vector<8x16xf32>, vector<1x16xf32> -> vector<1x16xf32>
    %52 = arith.addf %48, %51 : vector<1x16xf32>
    %53 = vector.extract_strided_slice %23 {offsets = [7, 0], sizes = [1, 8], strides = [1, 1]} : vector<16x8xf32> to vector<1x8xf32>
    %c56 = arith.constant 56 : index
    %c0_36 = arith.constant 0 : index
    %54 = vector.load %arg5[%c56, %c0_36] : memref<64x16xf32, #tpu.memory_space<vmem>>, vector<8x16xf32>
    %cst_37 = arith.constant dense<0.000000e+00> : vector<1x16xf32>
    %55 = tpu.matmul %53, %54, %cst_37 {dimension_numbers = #tpu.dot_dimension_numbers<[1], [0], [0], [1], [0, 0, 1, 1], [], []>} : vector<1x8xf32>, vector<8x16xf32>, vector<1x16xf32> -> vector<1x16xf32>
    %56 = arith.addf %52, %55 : vector<1x16xf32>
    %c3_38 = arith.constant 3 : index
    %c0_39 = arith.constant 0 : index
    %57 = vector.load %arg10[%c3_38, %c0_39] : memref<8x64xf32, #tpu.memory_space<vmem>>, vector<1x16xf32>
    %58 = vector.extract_strided_slice %23 {offsets = [8, 0], sizes = [1, 8], strides = [1, 1]} : vector<16x8xf32> to vector<1x8xf32>
    %c0_40 = arith.constant 0 : index
    %c0_41 = arith.constant 0 : index
    %59 = vector.load %arg5[%c0_40, %c0_41] : memref<64x16xf32, #tpu.memory_space<vmem>>, vector<8x16xf32>
    %cst_42 = arith.constant dense<0.000000e+00> : vector<1x16xf32>
    %60 = tpu.matmul %58, %59, %cst_42 {dimension_numbers = #tpu.dot_dimension_numbers<[1], [0], [0], [1], [0, 0, 1, 1], [], []>} : vector<1x8xf32>, vector<8x16xf32>, vector<1x16xf32> -> vector<1x16xf32>
    %61 = arith.addf %57, %60 : vector<1x16xf32>
    %62 = vector.extract_strided_slice %23 {offsets = [9, 0], sizes = [1, 8], strides = [1, 1]} : vector<16x8xf32> to vector<1x8xf32>
    %c8_43 = arith.constant 8 : index
    %c0_44 = arith.constant 0 : index
    %63 = vector.load %arg5[%c8_43, %c0_44] : memref<64x16xf32, #tpu.memory_space<vmem>>, vector<8x16xf32>
    %cst_45 = arith.constant dense<0.000000e+00> : vector<1x16xf32>
    %64 = tpu.matmul %62, %63, %cst_45 {dimension_numbers = #tpu.dot_dimension_numbers<[1], [0], [0], [1], [0, 0, 1, 1], [], []>} : vector<1x8xf32>, vector<8x16xf32>, vector<1x16xf32> -> vector<1x16xf32>
    %65 = arith.addf %61, %64 : vector<1x16xf32>
    %66 = vector.extract_strided_slice %23 {offsets = [10, 0], sizes = [1, 8], strides = [1, 1]} : vector<16x8xf32> to vector<1x8xf32>
    %c16_46 = arith.constant 16 : index
    %c0_47 = arith.constant 0 : index
    %67 = vector.load %arg5[%c16_46, %c0_47] : memref<64x16xf32, #tpu.memory_space<vmem>>, vector<8x16xf32>
    %cst_48 = arith.constant dense<0.000000e+00> : vector<1x16xf32>
    %68 = tpu.matmul %66, %67, %cst_48 {dimension_numbers = #tpu.dot_dimension_numbers<[1], [0], [0], [1], [0, 0, 1, 1], [], []>} : vector<1x8xf32>, vector<8x16xf32>, vector<1x16xf32> -> vector<1x16xf32>
    %69 = arith.addf %65, %68 : vector<1x16xf32>
    %70 = vector.extract_strided_slice %23 {offsets = [11, 0], sizes = [1, 8], strides = [1, 1]} : vector<16x8xf32> to vector<1x8xf32>
    %c24_49 = arith.constant 24 : index
    %c0_50 = arith.constant 0 : index
    %71 = vector.load %arg5[%c24_49, %c0_50] : memref<64x16xf32, #tpu.memory_space<vmem>>, vector<8x16xf32>
    %cst_51 = arith.constant dense<0.000000e+00> : vector<1x16xf32>
    %72 = tpu.matmul %70, %71, %cst_51 {dimension_numbers = #tpu.dot_dimension_numbers<[1], [0], [0], [1], [0, 0, 1, 1], [], []>} : vector<1x8xf32>, vector<8x16xf32>, vector<1x16xf32> -> vector<1x16xf32>
    %73 = arith.addf %69, %72 : vector<1x16xf32>
    %74 = vector.extract_strided_slice %23 {offsets = [12, 0], sizes = [1, 8], strides = [1, 1]} : vector<16x8xf32> to vector<1x8xf32>
    %c32_52 = arith.constant 32 : index
    %c0_53 = arith.constant 0 : index
    %75 = vector.load %arg5[%c32_52, %c0_53] : memref<64x16xf32, #tpu.memory_space<vmem>>, vector<8x16xf32>
    %cst_54 = arith.constant dense<0.000000e+00> : vector<1x16xf32>
    %76 = tpu.matmul %74, %75, %cst_54 {dimension_numbers = #tpu.dot_dimension_numbers<[1], [0], [0], [1], [0, 0, 1, 1], [], []>} : vector<1x8xf32>, vector<8x16xf32>, vector<1x16xf32> -> vector<1x16xf32>
    %77 = arith.addf %73, %76 : vector<1x16xf32>
    %78 = vector.extract_strided_slice %23 {offsets = [13, 0], sizes = [1, 8], strides = [1, 1]} : vector<16x8xf32> to vector<1x8xf32>
    %c40_55 = arith.constant 40 : index
    %c0_56 = arith.constant 0 : index
    %79 = vector.load %arg5[%c40_55, %c0_56] : memref<64x16xf32, #tpu.memory_space<vmem>>, vector<8x16xf32>
    %cst_57 = arith.constant dense<0.000000e+00> : vector<1x16xf32>
    %80 = tpu.matmul %78, %79, %cst_57 {dimension_numbers = #tpu.dot_dimension_numbers<[1], [0], [0], [1], [0, 0, 1, 1], [], []>} : vector<1x8xf32>, vector<8x16xf32>, vector<1x16xf32> -> vector<1x16xf32>
    %81 = arith.addf %77, %80 : vector<1x16xf32>
    %82 = vector.extract_strided_slice %23 {offsets = [14, 0], sizes = [1, 8], strides = [1, 1]} : vector<16x8xf32> to vector<1x8xf32>
    %c48_58 = arith.constant 48 : index
    %c0_59 = arith.constant 0 : index
    %83 = vector.load %arg5[%c48_58, %c0_59] : memref<64x16xf32, #tpu.memory_space<vmem>>, vector<8x16xf32>
    %cst_60 = arith.constant dense<0.000000e+00> : vector<1x16xf32>
    %84 = tpu.matmul %82, %83, %cst_60 {dimension_numbers = #tpu.dot_dimension_numbers<[1], [0], [0], [1], [0, 0, 1, 1], [], []>} : vector<1x8xf32>, vector<8x16xf32>, vector<1x16xf32> -> vector<1x16xf32>
    %85 = arith.addf %81, %84 : vector<1x16xf32>
    %86 = vector.extract_strided_slice %23 {offsets = [15, 0], sizes = [1, 8], strides = [1, 1]} : vector<16x8xf32> to vector<1x8xf32>
    %c56_61 = arith.constant 56 : index
    %c0_62 = arith.constant 0 : index
    %87 = vector.load %arg5[%c56_61, %c0_62] : memref<64x16xf32, #tpu.memory_space<vmem>>, vector<8x16xf32>
    %cst_63 = arith.constant dense<0.000000e+00> : vector<1x16xf32>
    %88 = tpu.matmul %86, %87, %cst_63 {dimension_numbers = #tpu.dot_dimension_numbers<[1], [0], [0], [1], [0, 0, 1, 1], [], []>} : vector<1x8xf32>, vector<8x16xf32>, vector<1x16xf32> -> vector<1x16xf32>
    %89 = arith.addf %85, %88 : vector<1x16xf32>
    %90 = tpu.concatenate %56, %89 in 0 : vector<1x16xf32>, vector<1x16xf32> -> vector<2x16xf32>
    %c0_64 = arith.constant 0 : index
    %c0_65 = arith.constant 0 : index
    %91 = vector.load %arg6[%c0_64, %c0_65] : memref<16x64xf32, #tpu.memory_space<vmem>>, vector<16x64xf32>
    %cst_66 = arith.constant dense<0.000000e+00> : vector<2x64xf32>
    %92 = tpu.matmul %90, %91, %cst_66 {dimension_numbers = #tpu.dot_dimension_numbers<[1], [0], [0], [1], [0, 0, 1, 1], [], []>} : vector<2x16xf32>, vector<16x64xf32>, vector<2x64xf32> -> vector<2x64xf32>
    %c4 = arith.constant 4 : index
    %c0_67 = arith.constant 0 : index
    %93 = vector.load %arg10[%c4, %c0_67] : memref<8x64xf32, #tpu.memory_space<vmem>>, vector<1x64xf32>
    %94 = vector.broadcast %93 : vector<1x64xf32> to vector<2x64xf32>
    %95 = arith.addf %92, %94 : vector<2x64xf32>
    %c0_68 = arith.constant 0 : index
    %c0_69 = arith.constant 0 : index
    %96 = vector.load %arg12[%c0_68, %c0_69] : memref<2x64xf32, #tpu.memory_space<vmem>>, vector<2x64xf32>
    tpu.vector_store %arg12[%c0_68, %c0_69], %95 {strides = array<i32>} : memref<2x64xf32, #tpu.memory_space<vmem>>, vector<2x64xf32>,
    %c0_70 = arith.constant 0 : index
    %c0_71 = arith.constant 0 : index
    %97 = vector.load %arg12[%c0_70, %c0_71] : memref<2x64xf32, #tpu.memory_space<vmem>>, vector<1x8xf32>
    %c0_72 = arith.constant 0 : index
    %c0_73 = arith.constant 0 : index
    %98 = vector.load %arg13[%c0_72, %c0_73] : memref<16x8xf32, #tpu.memory_space<vmem>>, vector<1x8xf32>
    tpu.vector_store %arg13[%c0_72, %c0_73], %97 {strides = array<i32>} : memref<16x8xf32, #tpu.memory_space<vmem>>, vector<1x8xf32>,
    %c0_74 = arith.constant 0 : index
    %c8_75 = arith.constant 8 : index
    %99 = vector.load %arg12[%c0_74, %c8_75] : memref<2x64xf32, #tpu.memory_space<vmem>>, vector<1x8xf32>
    %c1_76 = arith.constant 1 : index
    %c0_77 = arith.constant 0 : index
    %100 = vector.load %arg13[%c1_76, %c0_77] : memref<16x8xf32, #tpu.memory_space<vmem>>, vector<1x8xf32>
    tpu.vector_store %arg13[%c1_76, %c0_77], %99 {strides = array<i32>} : memref<16x8xf32, #tpu.memory_space<vmem>>, vector<1x8xf32>,
    %c0_78 = arith.constant 0 : index
    %c16_79 = arith.constant 16 : index
    %101 = vector.load %arg12[%c0_78, %c16_79] : memref<2x64xf32, #tpu.memory_space<vmem>>, vector<1x8xf32>
    %c2_80 = arith.constant 2 : index
    %c0_81 = arith.constant 0 : index
    %102 = vector.load %arg13[%c2_80, %c0_81] : memref<16x8xf32, #tpu.memory_space<vmem>>, vector<1x8xf32>
    tpu.vector_store %arg13[%c2_80, %c0_81], %101 {strides = array<i32>} : memref<16x8xf32, #tpu.memory_space<vmem>>, vector<1x8xf32>,
    %c0_82 = arith.constant 0 : index
    %c24_83 = arith.constant 24 : index
    %103 = vector.load %arg12[%c0_82, %c24_83] : memref<2x64xf32, #tpu.memory_space<vmem>>, vector<1x8xf32>
    %c3_84 = arith.constant 3 : index
    %c0_85 = arith.constant 0 : index
    %104 = vector.load %arg13[%c3_84, %c0_85] : memref<16x8xf32, #tpu.memory_space<vmem>>, vector<1x8xf32>
    tpu.vector_store %arg13[%c3_84, %c0_85], %103 {strides = array<i32>} : memref<16x8xf32, #tpu.memory_space<vmem>>, vector<1x8xf32>,
    %c0_86 = arith.constant 0 : index
    %c32_87 = arith.constant 32 : index
    %105 = vector.load %arg12[%c0_86, %c32_87] : memref<2x64xf32, #tpu.memory_space<vmem>>, vector<1x8xf32>
    %c4_88 = arith.constant 4 : index
    %c0_89 = arith.constant 0 : index
    %106 = vector.load %arg13[%c4_88, %c0_89] : memref<16x8xf32, #tpu.memory_space<vmem>>, vector<1x8xf32>
    tpu.vector_store %arg13[%c4_88, %c0_89], %105 {strides = array<i32>} : memref<16x8xf32, #tpu.memory_space<vmem>>, vector<1x8xf32>,
    %c0_90 = arith.constant 0 : index
    %c40_91 = arith.constant 40 : index
    %107 = vector.load %arg12[%c0_90, %c40_91] : memref<2x64xf32, #tpu.memory_space<vmem>>, vector<1x8xf32>
    %c5 = arith.constant 5 : index
    %c0_92 = arith.constant 0 : index
    %108 = vector.load %arg13[%c5, %c0_92] : memref<16x8xf32, #tpu.memory_space<vmem>>, vector<1x8xf32>
    tpu.vector_store %arg13[%c5, %c0_92], %107 {strides = array<i32>} : memref<16x8xf32, #tpu.memory_space<vmem>>, vector<1x8xf32>,
    %c0_93 = arith.constant 0 : index
    %c48_94 = arith.constant 48 : index
    %109 = vector.load %arg12[%c0_93, %c48_94] : memref<2x64xf32, #tpu.memory_space<vmem>>, vector<1x8xf32>
    %c6 = arith.constant 6 : index
    %c0_95 = arith.constant 0 : index
    %110 = vector.load %arg13[%c6, %c0_95] : memref<16x8xf32, #tpu.memory_space<vmem>>, vector<1x8xf32>
    tpu.vector_store %arg13[%c6, %c0_95], %109 {strides = array<i32>} : memref<16x8xf32, #tpu.memory_space<vmem>>, vector<1x8xf32>,
    %c0_96 = arith.constant 0 : index
    %c56_97 = arith.constant 56 : index
    %111 = vector.load %arg12[%c0_96, %c56_97] : memref<2x64xf32, #tpu.memory_space<vmem>>, vector<1x8xf32>
    %c7 = arith.constant 7 : index
    %c0_98 = arith.constant 0 : index
    %112 = vector.load %arg13[%c7, %c0_98] : memref<16x8xf32, #tpu.memory_space<vmem>>, vector<1x8xf32>
    tpu.vector_store %arg13[%c7, %c0_98], %111 {strides = array<i32>} : memref<16x8xf32, #tpu.memory_space<vmem>>, vector<1x8xf32>,
    %c1_99 = arith.constant 1 : index
    %c0_100 = arith.constant 0 : index
    %113 = vector.load %arg12[%c1_99, %c0_100] : memref<2x64xf32, #tpu.memory_space<vmem>>, vector<1x8xf32>
    %c8_101 = arith.constant 8 : index
    %c0_102 = arith.constant 0 : index
    %114 = vector.load %arg13[%c8_101, %c0_102] : memref<16x8xf32, #tpu.memory_space<vmem>>, vector<1x8xf32>
    tpu.vector_store %arg13[%c8_101, %c0_102], %113 {strides = array<i32>} : memref<16x8xf32, #tpu.memory_space<vmem>>, vector<1x8xf32>,
    %c1_103 = arith.constant 1 : index
    %c8_104 = arith.constant 8 : index
    %115 = vector.load %arg12[%c1_103, %c8_104] : memref<2x64xf32, #tpu.memory_space<vmem>>, vector<1x8xf32>
    %c9 = arith.constant 9 : index
    %c0_105 = arith.constant 0 : index
    %116 = vector.load %arg13[%c9, %c0_105] : memref<16x8xf32, #tpu.memory_space<vmem>>, vector<1x8xf32>
    tpu.vector_store %arg13[%c9, %c0_105], %115 {strides = array<i32>} : memref<16x8xf32, #tpu.memory_space<vmem>>, vector<1x8xf32>,
    %c1_106 = arith.constant 1 : index
    %c16_107 = arith.constant 16 : index
    %117 = vector.load %arg12[%c1_106, %c16_107] : memref<2x64xf32, #tpu.memory_space<vmem>>, vector<1x8xf32>
    %c10 = arith.constant 10 : index
    %c0_108 = arith.constant 0 : index
    %118 = vector.load %arg13[%c10, %c0_108] : memref<16x8xf32, #tpu.memory_space<vmem>>, vector<1x8xf32>
    tpu.vector_store %arg13[%c10, %c0_108], %117 {strides = array<i32>} : memref<16x8xf32, #tpu.memory_space<vmem>>, vector<1x8xf32>,
    %c1_109 = arith.constant 1 : index
    %c24_110 = arith.constant 24 : index
    %119 = vector.load %arg12[%c1_109, %c24_110] : memref<2x64xf32, #tpu.memory_space<vmem>>, vector<1x8xf32>
    %c11 = arith.constant 11 : index
    %c0_111 = arith.constant 0 : index
    %120 = vector.load %arg13[%c11, %c0_111] : memref<16x8xf32, #tpu.memory_space<vmem>>, vector<1x8xf32>
    tpu.vector_store %arg13[%c11, %c0_111], %119 {strides = array<i32>} : memref<16x8xf32, #tpu.memory_space<vmem>>, vector<1x8xf32>,
    %c1_112 = arith.constant 1 : index
    %c32_113 = arith.constant 32 : index
    %121 = vector.load %arg12[%c1_112, %c32_113] : memref<2x64xf32, #tpu.memory_space<vmem>>, vector<1x8xf32>
    %c12 = arith.constant 12 : index
    %c0_114 = arith.constant 0 : index
    %122 = vector.load %arg13[%c12, %c0_114] : memref<16x8xf32, #tpu.memory_space<vmem>>, vector<1x8xf32>
    tpu.vector_store %arg13[%c12, %c0_114], %121 {strides = array<i32>} : memref<16x8xf32, #tpu.memory_space<vmem>>, vector<1x8xf32>,
    %c1_115 = arith.constant 1 : index
    %c40_116 = arith.constant 40 : index
    %123 = vector.load %arg12[%c1_115, %c40_116] : memref<2x64xf32, #tpu.memory_space<vmem>>, vector<1x8xf32>
    %c13 = arith.constant 13 : index
    %c0_117 = arith.constant 0 : index
    %124 = vector.load %arg13[%c13, %c0_117] : memref<16x8xf32, #tpu.memory_space<vmem>>, vector<1x8xf32>
    tpu.vector_store %arg13[%c13, %c0_117], %123 {strides = array<i32>} : memref<16x8xf32, #tpu.memory_space<vmem>>, vector<1x8xf32>,
    %c1_118 = arith.constant 1 : index
    %c48_119 = arith.constant 48 : index
    %125 = vector.load %arg12[%c1_118, %c48_119] : memref<2x64xf32, #tpu.memory_space<vmem>>, vector<1x8xf32>
    %c14 = arith.constant 14 : index
    %c0_120 = arith.constant 0 : index
    %126 = vector.load %arg13[%c14, %c0_120] : memref<16x8xf32, #tpu.memory_space<vmem>>, vector<1x8xf32>
    tpu.vector_store %arg13[%c14, %c0_120], %125 {strides = array<i32>} : memref<16x8xf32, #tpu.memory_space<vmem>>, vector<1x8xf32>,
    %c1_121 = arith.constant 1 : index
    %c56_122 = arith.constant 56 : index
    %127 = vector.load %arg12[%c1_121, %c56_122] : memref<2x64xf32, #tpu.memory_space<vmem>>, vector<1x8xf32>
    %c15 = arith.constant 15 : index
    %c0_123 = arith.constant 0 : index
    %128 = vector.load %arg13[%c15, %c0_123] : memref<16x8xf32, #tpu.memory_space<vmem>>, vector<1x8xf32>
    tpu.vector_store %arg13[%c15, %c0_123], %127 {strides = array<i32>} : memref<16x8xf32, #tpu.memory_space<vmem>>, vector<1x8xf32>,
    %c0_124 = arith.constant 0 : index
    %c0_125 = arith.constant 0 : index
    %129 = vector.load %arg13[%c0_124, %c0_125] : memref<16x8xf32, #tpu.memory_space<vmem>>, vector<16x8xf32>
    %c0_126 = arith.constant 0 : index
    %c0_127 = arith.constant 0 : index
    %130 = vector.load %arg7[%c0_126, %c0_127] : memref<8x16xf32, #tpu.memory_space<vmem>>, vector<8x16xf32>
    %cst_128 = arith.constant dense<0.000000e+00> : vector<16x8xf32>
    %131 = tpu.matmul %0, %129, %cst_128 {dimension_numbers = #tpu.dot_dimension_numbers<[1], [0], [0], [1], [0, 0, 1, 1], [], []>} : vector<16x16xf32>, vector<16x8xf32>, vector<16x8xf32> -> vector<16x8xf32>
    %cst_129 = arith.constant dense<0.000000e+00> : vector<16x16xf32>
    %132 = tpu.matmul %131, %130, %cst_129 {dimension_numbers = #tpu.dot_dimension_numbers<[1], [0], [0], [1], [0, 0, 1, 1], [], []>} : vector<16x8xf32>, vector<8x16xf32>, vector<16x16xf32> -> vector<16x16xf32>
    %c5_130 = arith.constant 5 : index
    %c0_131 = arith.constant 0 : index
    %133 = vector.load %arg10[%c5_130, %c0_131] : memref<8x64xf32, #tpu.memory_space<vmem>>, vector<1x16xf32>
    %134 = vector.broadcast %133 : vector<1x16xf32> to vector<16x16xf32>
    %135 = arith.addf %132, %134 : vector<16x16xf32>
    %cst_132 = arith.constant 0.000000e+00 : f32
    %136 = vector.broadcast %cst_132 : f32 to vector<16x16xf32>
    %137 = arith.maximumf %135, %136 : vector<16x16xf32>
    %c0_133 = arith.constant 0 : index
    %c0_134 = arith.constant 0 : index
    %138 = vector.load %arg8[%c0_133, %c0_134] : memref<16x16xf32, #tpu.memory_space<vmem>>, vector<16x16xf32>
    %cst_135 = arith.constant dense<0.000000e+00> : vector<16x16xf32>
    %139 = tpu.matmul %0, %137, %cst_135 {dimension_numbers = #tpu.dot_dimension_numbers<[1], [0], [0], [1], [0, 0, 1, 1], [], []>} : vector<16x16xf32>, vector<16x16xf32>, vector<16x16xf32> -> vector<16x16xf32>
    %cst_136 = arith.constant dense<0.000000e+00> : vector<16x16xf32>
    %140 = tpu.matmul %139, %138, %cst_136 {dimension_numbers = #tpu.dot_dimension_numbers<[1], [0], [0], [1], [0, 0, 1, 1], [], []>} : vector<16x16xf32>, vector<16x16xf32>, vector<16x16xf32> -> vector<16x16xf32>
    %c6_137 = arith.constant 6 : index
    %c0_138 = arith.constant 0 : index
    %141 = vector.load %arg10[%c6_137, %c0_138] : memref<8x64xf32, #tpu.memory_space<vmem>>, vector<1x16xf32>
    %142 = vector.broadcast %141 : vector<1x16xf32> to vector<16x16xf32>
    %143 = arith.addf %140, %142 : vector<16x16xf32>
    %cst_139 = arith.constant 0.000000e+00 : f32
    %144 = vector.broadcast %cst_139 : f32 to vector<16x16xf32>
    %145 = arith.maximumf %143, %144 : vector<16x16xf32>
    %c0_140 = arith.constant 0 : index
    %c0_141 = arith.constant 0 : index
    %146 = vector.load %arg9[%c0_140, %c0_141] : memref<16x1xf32, #tpu.memory_space<vmem>>, vector<16x1xf32>
    %cst_142 = arith.constant dense<0.000000e+00> : vector<16x1xf32>
    %147 = tpu.matmul %145, %146, %cst_142 {dimension_numbers = #tpu.dot_dimension_numbers<[1], [0], [0], [1], [0, 0, 1, 1], [], []>} : vector<16x16xf32>, vector<16x1xf32>, vector<16x1xf32> -> vector<16x1xf32>
    %cst_143 = arith.constant dense<0.000000e+00> : vector<16x1xf32>
    %148 = tpu.matmul %0, %147, %cst_143 {dimension_numbers = #tpu.dot_dimension_numbers<[1], [0], [0], [1], [0, 0, 1, 1], [], []>} : vector<16x16xf32>, vector<16x1xf32>, vector<16x1xf32> -> vector<16x1xf32>
    %c7_144 = arith.constant 7 : index
    %c0_145 = arith.constant 0 : index
    %149 = vector.load %arg10[%c7_144, %c0_145] : memref<8x64xf32, #tpu.memory_space<vmem>>, vector<1x1xf32>
    %150 = vector.broadcast %149 : vector<1x1xf32> to vector<16x1xf32>
    %151 = arith.addf %148, %150 : vector<16x1xf32>
    %c0_146 = arith.constant 0 : index
    %c0_147 = arith.constant 0 : index
    %152 = vector.load %arg11[%c0_146, %c0_147] : memref<16x1xf32, #tpu.memory_space<vmem>>, vector<16x1xf32>
    tpu.vector_store %arg11[%c0_146, %c0_147], %151 {strides = array<i32>} : memref<16x1xf32, #tpu.memory_space<vmem>>, vector<16x1xf32>,
    return
  }
}

</mosaic_0001>

<bundles_post_ra>
// kernel: model3_forward.1
= control target key start
LH: loop header
LB: loop body
LE: loop exit
PB: predicated region body
PF: predicated region fallthrough
CT: control target
= control target key end

     0   :  { %vm43_vm0 = vcmask 130048   ;;  %vm82_vm1 = vcmask 1043456   ;;  %vm75_vm2 = vcmask 31744   ;;  %vm227_vm3 = vcmask 64512   ;;  %s984_s17 = smov 120   ;;  %s985_s18 = smov 80   ;;  %s1224_s1 = inlined_call_operand.vmem [shape: f32[16,4], index: 1, kind: input, shape index: {}]   ;;  %s1225_s0 = inlined_call_operand.vmem [shape: f32[16,16], index: 0, kind: input, shape index: {}]   ;;  %s1226_s10 = inlined_call_operand.vmem [shape: f32[8,64], index: 10, kind: input, shape index: {}]   ;;  %s1227_s2 = inlined_call_operand.vmem [shape: f32[4,16], index: 2, kind: input, shape index: {}]   ;;  %s1228_s3 = inlined_call_operand.vmem [shape: f32[16,16], index: 3, kind: input, shape index: {}]   ;;  %s1229_s4 = inlined_call_operand.vmem [shape: f32[16,8], index: 4, kind: input, shape index: {}]   ;;  %s1230_s5 = inlined_call_operand.vmem [shape: f32[64,16], index: 5, kind: input, shape index: {}]   ;;  %s1231_s6 = inlined_call_operand.vmem [shape: f32[16,64], index: 6, kind: input, shape index: {}]   ;;  %s1232_s7 = inlined_call_operand.vmem [shape: f32[8,16], index: 7, kind: input, shape index: {}]   ;;  %s1233_s8 = inlined_call_operand.vmem [shape: f32[16,16], index: 8, kind: input, shape index: {}]   ;;  %s1234_s9 = inlined_call_operand.vmem [shape: f32[16,1], index: 9, kind: input, shape index: {}]   ;;  %s1235_s11 = inlined_call_operand.vmem [shape: f32[16,1], index: 11, kind: output, shape index: {}]  }
   0x1   :  { %v41_v0 = vld [vmem:[%s1224_s1 + $0x8] sm:$0xff]  ;;  %v40_v1 = vld [vmem:[%s1224_s1] sm:$0xff]  ;;  %v277_v33 = vld [vmem:[%s1230_s5 + $0x10] sm:$0xff]  ;;  %vm622_vm4 = vcmask 1040384   ;;  %vm651_vm5 = vcmask 517120   ;;  %vm654_vm6 = vcmask 57344  }
   0x2   :  { %64 = vmatpush.msra.mxu0 %v41_v0  ;;  %964 = vmatpush.msra.mxu3 %v41_v0  ;;  %v1058_v2 = vld [vmem:[%s1225_s0] sm:$0xff]  ;;  %v1063_v3 = vld [vmem:[%s1225_s0 + $0x8] sm:$0xff]  ;;  %v302_v34 = vld [vmem:[%s1230_s5 + $0x18] sm:$0xff]  ;;  %s986_s19 = smov 96   ;;  %s987_s20 = smov 112   ;;  %vm915_vm7 = vcmask 7168  }
   0x3   :  { %v42_v4 = vld [vmem:[%s1227_s2] sm:$0xf]  ;;  %v112_v7 = vld [vmem:[%s1228_s3 + $0x8] sm:$0xff]  ;;  %v377_v38 = vld [vmem:[%s1230_s5 + $0x30] sm:$0xff]  ;;  %s988_s21 = smov 72  }
   0x4   :  { %65 = vmatpush.msra.mxu0 %v40_v1  ;;  %965 = vmatpush.msra.mxu3 %v40_v1  ;;  %v975_v9 = vld [vmem:[%s1226_s10] ss:$0 sm:$0xff]  ;;  %v170_v18 = vld [vmem:[%s1229_s4 + $0x8] sm:$0xff]  ;;  %v976_v20 = vld [vmem:[%s1226_s10 + $0x1] ss:$0 sm:$0xff] }
   0x5   :  { %922 = vmatmul.msk.f32.vlgmr.msra.gmra.mxu0 %vm43_vm0, %v1058_v2  ;;  %923 = vmatmul.msk.f32.vlgmr.msra.gmra.mxu3 %vm43_vm0, %v1063_v3  ;;  %v111_v15 = vld [vmem:[%s1228_s3] sm:$0xff]  ;;  %v252_v30 = vld [vmem:[%s1230_s5 + $0x8] sm:$0xff]  ;;  %v402_v42 = vld [vmem:[%s1230_s5 + $0x38] sm:$0xff]  ;;  %s982_s3 = smov 88  }
   0x6   :  { %924 = vmatpush.msk.msra.mxu1 %vm82_vm1, %v42_v4  ;;  %158 = vmatpush.msrb.mxu3 %v112_v7  ;;  %v169_v19 = vld [vmem:[%s1229_s4] sm:$0xff]  ;;  %v352_v32 = vld [vmem:[%s1230_s5 + $0x28] sm:$0xff]  ;;  %s983_s4 = smov 104  }
   0x7   :  { %v226_v29 = vld [vmem:[%s1230_s5] sm:$0xff]  ;;  %v625_v58 = vld [vmem:[%s1231_s6 + $0x8] sm:$0xff] }
   0x8   :  { %159 = vmatpush.msrb.mxu3 %v111_v15  ;;  %v327_v31 = vld [vmem:[%s1230_s5 + $0x20] sm:$0xff] }
   0x9   :  { %v977_v35 = vld [vmem:[%s1226_s10 + $0x2] ss:$0 sm:$0xff]  ;;  %v225_v60 = vld [vmem:[%s1226_s10 + $0x3] sm:$0x1] }
   0xa   :  { %271 = vmatpush.msra.mxu3 %v252_v30  ;;  %v624_v59 = vld [vmem:[%s1231_s6] sm:$0xff] }
  0x82   :  { %v67_v5 = vpop.f32.mrf.mxu0 }
  0x83   :  { %925 = vmatmul.msk.f32.vlgmr.msra.gmra.mxu1 %vm75_vm2, %v67_v5 }
  0x88   :  { %v70_v6 = vpop.f32.mrf.mxu3 }
  0x8b   :  { %926 = vmatmul.msk.f32.gmra.mxu1 %vm75_vm2, %v70_v6 }
 0x100   :  { %v103_v8 = vpop.f32.mrf.mxu1 }
 0x101   :  { %v104_v11 = vadd.f32 %v975_v9, %v103_v8 }
 0x103   :  { %v109_v14 = vmax.f32 %v104_v11, 0.0 }
 0x108   :  { %v106_v10 = vpop.f32.mrf.mxu1 }
 0x109   :  { %v107_v12 = vadd.f32 %v975_v9, %v106_v10 }
 0x10b   :  { %v110_v13 = vmax.f32 %v107_v12, 0.0 }
 0x10d   :  { %127 = vmatpush.msrb.mxu1 %v110_v13  ;;  %966 = vmatpush.msra.mxu2 %v110_v13 }
 0x10f   :  { %128 = vmatpush.msrb.mxu1 %v109_v14  ;;  %967 = vmatpush.msra.mxu2 %v109_v14 }
 0x110   :  { %927 = vmatmul.msk.f32.vlgmr.msrb.gmra.mxu1 %vm43_vm0, %v1058_v2  ;;  %928 = vmatmul.msk.f32.vlgmr.msra.gmra.mxu2 %vm43_vm0, %v1063_v3 }
 0x111   :  { %191 = vmatpush.msra.mxu1 %v170_v18  ;;  %246 = vmatpush.msrb.mxu2 %v226_v29 }
 0x113   :  { %192 = vmatpush.msra.mxu1 %v169_v19  ;;  %296 = vmatpush.msra.mxu2 %v277_v33 }
 0x115   :  { %346 = vmatpush.msrb.mxu1 %v327_v31 }
 0x18d   :  { %v130_v16 = vpop.f32.mrf.mxu1 }
 0x18e   :  { %929 = vmatmul.msk.f32.vlgmr.msrb.gmra.mxu3 %vm43_vm0, %v130_v16 }
 0x18f   :  { %321 = vmatpush.msrb.mxu3 %v302_v34 }
 0x193   :  { %v133_v17 = vpop.f32.mrf.mxu2 }
 0x196   :  { %930 = vmatmul.msk.f32.gmra.mxu3 %vm43_vm0, %v133_v17 }
 0x211   :  { %v161_v21 = vpop.f32.mrf.mxu3 }
 0x212   :  { %v162_v22 = vadd.f32 %v976_v20, %v161_v21 }
 0x214   :  { %v167_v23 = vmax.f32 %v162_v22, 0.0 }
 0x216   :  { %931 = vmatmul.msk.f32.vlgmr.msra.gmra.mxu1 %vm43_vm0, %v167_v23 }
 0x217   :  { %445 = vmatpush.msra.mxu1 %v226_v29 }
 0x219   :  { %v164_v24 = vpop.f32.mrf.mxu3 }
 0x21a   :  { %v165_v25 = vadd.f32 %v976_v20, %v164_v24 }
 0x21c   :  { %v168_v26 = vmax.f32 %v165_v25, 0.0 }
 0x21e   :  { %932 = vmatmul.msk.f32.gmra.mxu1 %vm43_vm0, %v168_v26 }
 0x293   :  { %v194_v27 = vpop.f32.mrf.mxu1 }
 0x29b   :  { %v197_v28 = vpop.f32.mrf.mxu1 }
 0x29c   :  { %216 = vmatpush.msrb.mxu0 %v197_v28 }
 0x29e   :  { %217 = vmatpush.msrb.mxu0 %v194_v27 }
 0x29f   :  { %933 = vmatmul.msk.f32.vlgmr.msrb.gmra.mxu0 %vm43_vm0, %v1058_v2 }
 0x2a0   :  { %371 = vmatpush.msra.mxu0 %v352_v32 }
 0x2a2   :  { %469 = vmatpush.msrb.mxu0 %v252_v30 }
 0x2a7   :  { %934 = vmatmul.msk.f32.gmra.mxu0 %vm43_vm0, %v1063_v3 }
 0x31c   :  { %v219_v36 = vpop.f32.mrf.mxu0 }
 0x31d   :  { %v220_v37 = vadd.f32 %v977_v35, %v219_v36 }
 0x31f   :  { %935 = vmatmul.msk.f32.vlgmr.msrb.gmra.mxu2 %vm227_vm3, %v220_v37  ;;  %v253_v39 = vrot.slane %v220_v37, 1  ;;  %v328_v40 = vrot.slane %v220_v37, 4  ;;  %v353_v41 = vrot.slane %v220_v37, 5  ;;  %v278_v44 = vrot.slane %v220_v37, 2 }
 0x320   :  { %396 = vmatpush.msrb.mxu2 %v377_v38  ;;  %v303_v46 = vrot.slane %v220_v37, 3  ;;  %v378_v48 = vrot.slane %v220_v37, 6  ;;  %v403_v51 = vrot.slane %v220_v37, 7 }
 0x321   :  { %936 = vmatmul.msk.f32.vlgmr.msra.gmra.mxu3 %vm227_vm3, %v253_v39  ;;  %939 = vmatmul.msk.f32.vlgmr.msrb.gmra.mxu1 %vm227_vm3, %v328_v40 }
 0x322   :  { %940 = vmatmul.msk.f32.vlgmr.msra.gmra.mxu0 %vm227_vm3, %v353_v41  ;;  %421 = vmatpush.msra.mxu3 %v402_v42 }
 0x323   :  { %541 = vmatpush.msrb.mxu1 %v327_v31  ;;  %565 = vmatpush.msra.mxu0 %v352_v32  ;;  %v978_v31 = vld [vmem:[%s1226_s10 + $0x4] ss:$0 sm:$0xff] }
 0x324   :  { %v222_v43 = vpop.f32.mrf.mxu0 }
 0x325   :  { %v223_v45 = vadd.f32 %v977_v35, %v222_v43 }
 0x327   :  { %937 = vmatmul.msk.f32.vlgmr.msra.gmra.mxu2 %vm227_vm3, %v278_v44  ;;  %v451_v47 = vrot.slane %v223_v45, 1  ;;  %v523_v49 = vrot.slane %v223_v45, 4  ;;  %v547_v50 = vrot.slane %v223_v45, 5  ;;  %v475_v52 = vrot.slane %v223_v45, 2 }
 0x328   :  { %493 = vmatpush.msra.mxu2 %v277_v33  ;;  %v499_v53 = vrot.slane %v223_v45, 3  ;;  %v571_v54 = vrot.slane %v223_v45, 6  ;;  %v595_v55 = vrot.slane %v223_v45, 7 }
 0x329   :  { %938 = vmatmul.msk.f32.vlgmr.msrb.gmra.mxu3 %vm227_vm3, %v303_v46  ;;  %943 = vmatmul.msk.f32.vlgmr.msra.gmra.mxu1 %vm227_vm3, %v223_v45 }
 0x32a   :  { %944 = vmatmul.msk.f32.vlgmr.msrb.gmra.mxu0 %vm227_vm3, %v451_v47  ;;  %517 = vmatpush.msrb.mxu3 %v302_v34 }
 0x32b   :  { %645 = vmatpush.msra.mxu1 %v625_v58 }
 0x32d   :  { %646 = vmatpush.msra.mxu1 %v624_v59 }
 0x32f   :  { %941 = vmatmul.msk.f32.vlgmr.msrb.gmra.mxu2 %vm227_vm3, %v378_v48 }
 0x330   :  { %589 = vmatpush.msrb.mxu2 %v377_v38 }
 0x331   :  { %942 = vmatmul.msk.f32.vlgmr.msra.gmra.mxu3 %vm227_vm3, %v403_v51  ;;  %947 = vmatmul.msk.f32.vlgmr.msrb.gmra.mxu1 %vm227_vm3, %v523_v49 }
 0x332   :  { %948 = vmatmul.msk.f32.vlgmr.msra.gmra.mxu0 %vm227_vm3, %v547_v50  ;;  %613 = vmatpush.msra.mxu3 %v402_v42 }
 0x337   :  { %945 = vmatmul.msk.f32.vlgmr.msra.gmra.mxu2 %vm227_vm3, %v475_v52 }
 0x339   :  { %946 = vmatmul.msk.f32.vlgmr.msrb.gmra.mxu3 %vm227_vm3, %v499_v53 }
 0x33f   :  { %949 = vmatmul.msk.f32.vlgmr.msrb.gmra.mxu2 %vm227_vm3, %v571_v54 }
 0x341   :  { %950 = vmatmul.msk.f32.vlgmr.msra.gmra.mxu3 %vm227_vm3, %v595_v55 }
 0x39e   :  { %v348_v62 = vpop.f32.mrf.mxu1 }
 0x39f   :  { %v373_v1 = vpop.f32.mrf.mxu0 }
 0x3a2   :  { %v248_v56 = vpop.f32.mrf.mxu2 }
 0x3a3   :  { %v251_v0 = vadd.f32 %v248_v56, %v225_v60 }
 0x3a4   :  { %v273_v57 = vpop.f32.mrf.mxu3 }
 0x3a5   :  { %v276_v4 = vadd.f32 %v273_v57, %v251_v0 }
 0x3a6   :  { %v447_v7 = vpop.f32.mrf.mxu1 }
 0x3a7   :  { %v450_v9 = vadd.f32 %v447_v7, %v225_v60  ;;  %v471_v10 = vpop.f32.mrf.mxu0  ;;  %v802_v7 = vld [vmem:[%s1233_s8 + $0x8] sm:$0xff] }
 0x3a8   :  { %848 = vmatpush.msrb.mxu1 %v802_v7 }
 0x3a9   :  { %v474_v12 = vadd.f32 %v471_v10, %v450_v9  ;;  %v979_v9 = vld [vmem:[%s1226_s10 + $0x5] ss:$0 sm:$0xff] }
 0x3aa   :  { %v298_v61 = vpop.f32.mrf.mxu2 }
 0x3ab   :  { %v301_v6 = vadd.f32 %v298_v61, %v276_v4  ;;  %v744_v4 = vld [vmem:[%s1232_s7] sm:$0xff] }
 0x3ac   :  { %v323_v63 = vpop.f32.mrf.mxu3  ;;  %791 = vmatpush.msra.mxu2 %v744_v4 }
 0x3ad   :  { %v326_v11 = vadd.f32 %v323_v63, %v301_v6 }
 0x3ae   :  { %v543_v18 = vpop.f32.mrf.mxu1 }
 0x3af   :  { %v351_v14 = vadd.f32 %v348_v62, %v326_v11  ;;  %v567_v21 = vpop.f32.mrf.mxu0 }
 0x3b1   :  { %v376_v19 = vadd.f32 %v373_v1, %v351_v14 }
 0x3b2   :  { %v398_v5 = vpop.f32.mrf.mxu2 }
 0x3b3   :  { %v401_v24 = vadd.f32 %v398_v5, %v376_v19  ;;  %v859_v19 = vld [vmem:[%s1234_s9] sm:$0xff] }
 0x3b4   :  { %v423_v8 = vpop.f32.mrf.mxu3 }
 0x3b5   :  { %v426_v28 = vadd.f32 %v423_v8, %v401_v24 }
 0x3ba   :  { %v495_v13 = vpop.f32.mrf.mxu2 }
 0x3bb   :  { %v498_v15 = vadd.f32 %v495_v13, %v474_v12 }
 0x3bc   :  { %v519_v16 = vpop.f32.mrf.mxu3 }
 0x3bd   :  { %v522_v17 = vadd.f32 %v519_v16, %v498_v15  ;;  %v801_v15 = vld [vmem:[%s1233_s8] sm:$0xff] }
 0x3be   :  { %849 = vmatpush.msrb.mxu1 %v801_v15 }
 0x3bf   :  { %v546_v20 = vadd.f32 %v543_v18, %v522_v17  ;;  %v860_v18 = vld [vmem:[%s1234_s9 + $0x8] sm:$0xff] }
 0x3c1   :  { %v570_v22 = vadd.f32 %v567_v21, %v546_v20  ;;  %v980_v20 = vld [vmem:[%s1226_s10 + $0x6] ss:$0 sm:$0xff] }
 0x3c2   :  { %v591_v23 = vpop.f32.mrf.mxu2 }
 0x3c3   :  { %v594_v25 = vadd.f32 %v591_v23, %v570_v22 }
 0x3c4   :  { %v615_v26 = vpop.f32.mrf.mxu3 }
 0x3c5   :  { %v618_v27 = vadd.f32 %v615_v26, %v594_v25 }
 0x3c7   :  { %v620_v29 = vrot.slane %v618_v27, 7 }
 0x3c9   :  { %v623_v30 = vsel %vm622_vm4, %v426_v28, %v620_v29  ;;  %v981_v29 = vld [vmem:[%s1226_s10 + $0x7] ss:$0 sm:$0xff] }
 0x3ca   :  { %951 = vmatmul.msk.f32.vlgmr.msra.gmra.mxu1 %vm43_vm0, %v623_v30 }
 0x447   :  { %v648_v32 = vpop.f32.mrf.mxu1 }
 0x448   :  { %v649_v33 = vadd.f32 %v978_v31, %v648_v32 }
 0x44a   :  { %652 = vst.msk [vmem:[#allocation2] sm:$0x3] %vm651_vm5, %v649_v33 }
 0x451   :  { %v724_v34 = vld [vmem:[#allocation2 + $0x1] sm:$0x1]  ;;  %v653_v37 = vld [vmem:[#allocation2] sm:$0x1] }
 0x452   :  { %726 = vrot.lane.b32.xlu2 %v724_v34, %s982_s3  ;;  %v712_v35 = vld [vmem:[#allocation2 + $0x1] sm:$0x1]  ;;  %655 = vst.msk [vmem:[#allocation3] sm:$0x1] %vm654_vm6, %v653_v37  ;;  %v662_v42 = vld [vmem:[#allocation2] sm:$0x1] }
 0x453   :  { %v700_v36 = vld [vmem:[#allocation2 + $0x1] sm:$0x1]  ;;  %714 = vrot.lane.b32.xlu1 %v712_v35, %s983_s4  ;;  %v656_v44 = vld [vmem:[#allocation2] sm:$0x1] }
 0x454   :  { %702 = vrot.lane.b32.xlu0 %v700_v36, %s984_s17  ;;  %v698_v38 = vld [vmem:[#allocation2 + $0x1] sm:$0x1]  ;;  %v680_v45 = vld [vmem:[#allocation2] sm:$0x1] }
 0x455   :  { %699 = vst.msk [vmem:[#allocation3 + $0x8] sm:$0x1] %vm654_vm6, %v698_v38  ;;  %v730_v39 = vld [vmem:[#allocation2 + $0x1] sm:$0x1]  ;;  %v668_v46 = vld [vmem:[#allocation2] sm:$0x1] }
 0x456   :  { %v718_v40 = vld [vmem:[#allocation2 + $0x1] sm:$0x1]  ;;  %v674_v47 = vld [vmem:[#allocation2] sm:$0x1] }
 0x457   :  { %v706_v41 = vld [vmem:[#allocation2 + $0x1] sm:$0x1]  ;;  %v686_v48 = vld [vmem:[#allocation2] sm:$0x1] }
 0x458   :  { %v736_v43 = vld [vmem:[#allocation2 + $0x1] sm:$0x1]  ;;  %v692_v49 = vld [vmem:[#allocation2] sm:$0x1] }
 0x45a   :  { %732 = vrot.lane.b32.xlu2 %v730_v39, %s985_s18 }
 0x45b   :  { %720 = vrot.lane.b32.xlu1 %v718_v40, %s986_s19 }
 0x45c   :  { %708 = vrot.lane.b32.xlu0 %v706_v41, %s987_s20 }
 0x462   :  { %664 = vrot.lane.b32.xlu2 %v662_v42, %s987_s20 }
 0x463   :  { %658 = vrot.lane.b32.xlu1 %v656_v44, %s984_s17 }
 0x464   :  { %738 = vrot.lane.b32.xlu0 %v736_v43, %s988_s21 }
 0x46a   :  { %682 = vrot.lane.b32.xlu2 %v680_v45, %s982_s3 }
 0x46b   :  { %676 = vrot.lane.b32.xlu1 %v674_v47, %s986_s19 }
 0x46c   :  { %670 = vrot.lane.b32.xlu0 %v668_v46, %s983_s4 }
 0x473   :  { %694 = vrot.lane.b32.xlu1 %v692_v49, %s988_s21 }
 0x474   :  { %688 = vrot.lane.b32.xlu0 %v686_v48, %s985_s18 }
 0x4ac   :  { %v727_v50 = vpop.permute.xlu2 %726 }
 0x4ad   :  { %729 = vst.msk [vmem:[#allocation3 + $0xd] sm:$0x1] %vm654_vm6, %v727_v50 }
 0x4b4   :  { %v733_v51 = vpop.permute.xlu2 %732 }
 0x4b5   :  { %735 = vst.msk [vmem:[#allocation3 + $0xe] sm:$0x1] %vm654_vm6, %v733_v51 }
 0x4bc   :  { %v665_v52 = vpop.permute.xlu2 %664 }
 0x4bd   :  { %667 = vst.msk [vmem:[#allocation3 + $0x2] sm:$0x1] %vm654_vm6, %v665_v52 }
 0x4c4   :  { %v683_v53 = vpop.permute.xlu2 %682 }
 0x4c5   :  { %v715_v54 = vpop.permute.xlu1 %714  ;;  %685 = vst.msk [vmem:[#allocation3 + $0x5] sm:$0x1] %vm654_vm6, %v683_v53 }
 0x4c6   :  { %v703_v55 = vpop.permute.xlu0 %702  ;;  %717 = vst.msk [vmem:[#allocation3 + $0xb] sm:$0x1] %vm654_vm6, %v715_v54 }
 0x4c7   :  { %705 = vst.msk [vmem:[#allocation3 + $0x9] sm:$0x1] %vm654_vm6, %v703_v55 }
 0x4cd   :  { %v721_v56 = vpop.permute.xlu1 %720 }
 0x4ce   :  { %v709_v57 = vpop.permute.xlu0 %708  ;;  %723 = vst.msk [vmem:[#allocation3 + $0xc] sm:$0x1] %vm654_vm6, %v721_v56 }
 0x4cf   :  { %711 = vst.msk [vmem:[#allocation3 + $0xa] sm:$0x1] %vm654_vm6, %v709_v57 }
 0x4d5   :  { %v659_v59 = vpop.permute.xlu1 %658 }
 0x4d6   :  { %v739_v58 = vpop.permute.xlu0 %738  ;;  %661 = vst.msk [vmem:[#allocation3 + $0x1] sm:$0x1] %vm654_vm6, %v659_v59 }
 0x4d7   :  { %741 = vst.msk [vmem:[#allocation3 + $0xf] sm:$0x1] %vm654_vm6, %v739_v58 }
 0x4dd   :  { %v677_v61 = vpop.permute.xlu1 %676 }
 0x4de   :  { %v671_v60 = vpop.permute.xlu0 %670  ;;  %v743_v62 = vld [vmem:[#allocation3 + $0x8] sm:$0xff]  ;;  %679 = vst.msk [vmem:[#allocation3 + $0x4] sm:$0x1] %vm654_vm6, %v677_v61 }
 0x4df   :  { %673 = vst.msk [vmem:[#allocation3 + $0x3] sm:$0x1] %vm654_vm6, %v671_v60  ;;  %759 = vmatpush.msrb.mxu0 %v743_v62 }
 0x4e5   :  { %v695_v0 = vpop.permute.xlu1 %694 }
 0x4e6   :  { %v689_v63 = vpop.permute.xlu0 %688  ;;  %697 = vst.msk [vmem:[#allocation3 + $0x7] sm:$0x1] %vm654_vm6, %v695_v0 }
 0x4e7   :  { %691 = vst.msk [vmem:[#allocation3 + $0x6] sm:$0x1] %vm654_vm6, %v689_v63 }
 0x4ee   :  { %v742_v1 = vld [vmem:[#allocation3] sm:$0xff] }
 0x4ef   :  { %760 = vmatpush.msrb.mxu0 %v742_v1 }
 0x4f0   :  { %952 = vmatmul.msk.f32.vlgmr.msrb.gmra.mxu0 %vm43_vm0, %v1058_v2 }
 0x4f1   :  { %881 = vmatpush.msra.mxu0 %v860_v18 }
 0x4f3   :  { %882 = vmatpush.msra.mxu0 %v859_v19 }
 0x4f8   :  { %953 = vmatmul.msk.f32.gmra.mxu0 %vm43_vm0, %v1063_v3 }
 0x56d   :  { %v762_v5 = vpop.f32.mrf.mxu0 }
 0x56e   :  { %954 = vmatmul.msk.f32.vlgmr.msra.gmra.mxu2 %vm227_vm3, %v762_v5 }
 0x575   :  { %v765_v6 = vpop.f32.mrf.mxu0 }
 0x576   :  { %955 = vmatmul.msk.f32.gmra.mxu2 %vm227_vm3, %v765_v6 }
 0x5f1   :  { %v793_v8 = vpop.f32.mrf.mxu2 }
 0x5f2   :  { %v794_v11 = vadd.f32 %v979_v9, %v793_v8 }
 0x5f4   :  { %v799_v14 = vmax.f32 %v794_v11, 0.0 }
 0x5f9   :  { %v796_v10 = vpop.f32.mrf.mxu2 }
 0x5fa   :  { %v797_v12 = vadd.f32 %v979_v9, %v796_v10 }
 0x5fc   :  { %v800_v13 = vmax.f32 %v797_v12, 0.0 }
 0x5fe   :  { %817 = vmatpush.msrb.mxu3 %v800_v13 }
 0x600   :  { %818 = vmatpush.msrb.mxu3 %v799_v14 }
 0x601   :  { %956 = vmatmul.msk.f32.vlgmr.msrb.gmra.mxu3 %vm43_vm0, %v1058_v2 }
 0x609   :  { %957 = vmatmul.msk.f32.gmra.mxu3 %vm43_vm0, %v1063_v3 }
 0x684   :  { %v820_v16 = vpop.f32.mrf.mxu3 }
 0x685   :  { %958 = vmatmul.msk.f32.vlgmr.msrb.gmra.mxu1 %vm43_vm0, %v820_v16 }
 0x68c   :  { %v823_v17 = vpop.f32.mrf.mxu3 }
 0x68d   :  { %959 = vmatmul.msk.f32.gmra.mxu1 %vm43_vm0, %v823_v17 }
 0x702   :  { %v851_v21 = vpop.f32.mrf.mxu1 }
 0x703   :  { %v852_v22 = vadd.f32 %v980_v20, %v851_v21 }
 0x705   :  { %v857_v23 = vmax.f32 %v852_v22, 0.0 }
 0x707   :  { %960 = vmatmul.msk.f32.vlgmr.msra.gmra.mxu0 %vm43_vm0, %v857_v23 }
 0x70a   :  { %v854_v24 = vpop.f32.mrf.mxu1 }
 0x70b   :  { %v855_v25 = vadd.f32 %v980_v20, %v854_v24 }
 0x70d   :  { %v858_v26 = vmax.f32 %v855_v25, 0.0 }
 0x70f   :  { %961 = vmatmul.msk.f32.gmra.mxu0 %vm43_vm0, %v858_v26 }
 0x784   :  { %v884_v27 = vpop.f32.mrf.mxu0 }
 0x78c   :  { %v887_v28 = vpop.f32.mrf.mxu0 }
 0x78d   :  { %906 = vmatpush.msrb.mxu2 %v887_v28 }
 0x78f   :  { %907 = vmatpush.msrb.mxu2 %v884_v27 }
 0x790   :  { %962 = vmatmul.msk.f32.vlgmr.msrb.gmra.mxu2 %vm43_vm0, %v1058_v2 }
 0x798   :  { %963 = vmatmul.msk.f32.gmra.mxu2 %vm43_vm0, %v1063_v3 }
 0x813   :  { %v909_v30 = vpop.f32.mrf.mxu2 }
 0x814   :  { %v910_v31 = vadd.f32 %v981_v29, %v909_v30 }
 0x816   :  { %916 = vst.msk [vmem:[%s1235_s11] sm:$0xff] %vm915_vm7, %v910_v31 }
 0x81b   :  { %v912_v32 = vpop.f32.mrf.mxu2 }
 0x81c   :  { %v913_v33 = vadd.f32 %v981_v29, %v912_v32 }
 0x81e   :  { %917 = vst.msk [vmem:[%s1235_s11 + $0x8] sm:$0xff] %vm915_vm7, %v913_v33 }

</bundles_post_ra>
